<compile_context>
chip_gen: v5e
topology: v5e:2x2
jax: 0.10.0
libtpu: 0.0.40
codegen_flags: <defaults>
</compile_context>

<pallas_src>
import functools

import jax
import jax.numpy as jnp
from jax.experimental import pallas as pl
from jax.experimental.pallas import tpu as pltpu


def _round_up(x, m):
    return ((x + m - 1) // m) * m


def _pick_divisor_tile(dim, max_tile, align=128):
    """Largest multiple of `align` that divides `dim` and is <= max_tile."""
    best = align
    t = align
    limit = min(dim, max(align, max_tile))
    while t <= limit:
        if dim % t == 0:
            best = t
        t += align
    return best


_VMEM_BUDGET = None


def _vmem_budget_bytes():
    """~70% of per-TensorCore VMEM (headroom for compiler scratch/semaphores)."""
    global _VMEM_BUDGET
    if _VMEM_BUDGET is None:
        try:
            cap = int(pltpu.get_tpu_info().vmem_capacity_bytes)
        except Exception:
            cap = 64 << 20  # conservative default (v7x per-TC VMEM)
        _VMEM_BUDGET = max(16 << 20, min(int(cap * 0.70), 100 << 20))
    return _VMEM_BUDGET


# --------------------------------------------------------------------------- #
# Kernels
# --------------------------------------------------------------------------- #
def _linear_kernel_single_k(*refs, compute_dtype, has_bias):
    """Whole K in one tile: no scratch accumulator, direct store."""
    if has_bias:
        x_ref, w_ref, b_ref, o_ref = refs
    else:
        x_ref, w_ref, o_ref = refs
    acc = jnp.dot(
        x_ref[...].astype(compute_dtype),
        w_ref[...].astype(compute_dtype),
        preferred_element_type=jnp.float32,
    )
    if has_bias:
        acc = acc + b_ref[...].astype(jnp.float32)
    o_ref[...] = acc.astype(o_ref.dtype)


def _linear_kernel_multi_k(*refs, compute_dtype, has_bias):
    """K streamed over the last grid axis; f32 VMEM accumulator (P1+P3)."""
    if has_bias:
        x_ref, w_ref, b_ref, o_ref, acc_ref = refs
    else:
        x_ref, w_ref, o_ref, acc_ref = refs

    k = pl.program_id(2)

    @pl.when(k == 0)
    def _():
        if has_bias:
            # Fold the bias into the accumulator init (saves a VPU pass later).
            acc_ref[...] = jnp.broadcast_to(
                b_ref[...].astype(jnp.float32), acc_ref.shape
            )
        else:
            acc_ref[...] = jnp.zeros_like(acc_ref)

    acc_ref[...] += jnp.dot(
        x_ref[...].astype(compute_dtype),
        w_ref[...].astype(compute_dtype),
        preferred_element_type=jnp.float32,
    )

    @pl.when(k == pl.num_programs(2) - 1)
    def _():
        o_ref[...] = acc_ref[...].astype(o_ref.dtype)


# --------------------------------------------------------------------------- #
# Forward (jitted; weight already in padded (Kp, Np) layout)
# --------------------------------------------------------------------------- #
def _linear_forward(x, w_kn, b_row, *, out_dim, compute_dtype):
    *lead, K = x.shape
    Kp, Np = w_kn.shape
    has_bias = b_row is not None

    M = 1
    for d in lead:
        M *= d

    x_isz = jnp.dtype(x.dtype).itemsize
    w_isz = jnp.dtype(w_kn.dtype).itemsize
    o_isz = x_isz
    b_isz = jnp.dtype(b_row.dtype).itemsize if has_bias else 0

    # ---- Tile selection -----------------------------------------------------
    # Sublane multiple depends on dtype packing (f32:8, 16-bit:16, 8-bit:32).
    sub = {4: 8, 2: 16, 1: 32}.get(x_isz, 8)

    # M tiles: balance so padding waste is minimal, tm <= 512.
    nm = -(-M // 512)
    tm = _round_up(-(-M // nm), sub)
    Mp = nm * tm

    # K tiles: collapse the K grid axis when the whole padded K fits.
    k_isz = max(x_isz, w_isz)
    max_tk_collapse = 2048 if k_isz >= 4 else 4096
    if Kp <= max_tk_collapse:
        tk = Kp
    else:
        tk = _pick_divisor_tile(Kp, 1024)

    # N tiles: big & lane-dense, but keep >= 2 parallel (i,j) tiles when M
    # gives only one tile (both v7x TensorCores get work).
    max_tn = 1024
    if nm == 1 and Np >= 256:
        max_tn = min(max_tn, (Np // 2) // 128 * 128)
    tn = _pick_divisor_tile(Np, max_tn)

    # ---- Fit tiles into the VMEM budget (double-buffered in/out + scratch) --
    budget = _vmem_budget_bytes()

    def footprint(tm_, tn_, tk_):
        f = 2 * tm_ * tk_ * x_isz          # x, double-buffered
        f += 2 * tk_ * tn_ * w_isz         # w, double-buffered
        f += 2 * tm_ * tn_ * o_isz         # out, double-buffered
        if has_bias:
            f += 2 * tn_ * b_isz
        if Kp // tk_ > 1:
            f += tm_ * tn_ * 4             # f32 accumulator scratch
        return f

    while footprint(tm, tn, tk) > budget:
        if tk >= tn and tk > 128:
            tk = _pick_divisor_tile(Kp, max(128, tk // 2))
        elif tn > 128:
            tn = _pick_divisor_tile(Np, max(128, tn // 2))
        elif tm > sub:
            tm = max(sub, _round_up(tm // 2, sub))
        else:
            break

    Mp = _round_up(M, tm)
    nm = Mp // tm
    nn = Np // tn
    nk = Kp // tk

    # ---- Pad the activation (only; weight/bias were padded once outside) ----
    x2d = x.reshape(M, K)
    if Mp != M or Kp != K:
        x2d = jnp.pad(x2d, ((0, Mp - M), (0, Kp - K)))

    # ---- Grid ordering: keep the larger operand VMEM-resident across the
    #      inner spatial axis (exact win when nk == 1).
    x_bytes = Mp * Kp * x_isz
    w_bytes = Kp * Np * w_isz
    traffic_m_outer = x_bytes + nm * w_bytes   # inner axis = N  -> x resident
    traffic_n_outer = w_bytes + nn * x_bytes   # inner axis = M  -> w resident
    m_outer = traffic_m_outer <= traffic_n_outer

    if nk == 1:
        if m_outer:
            grid = (nm, nn)
            x_map = lambda i, j: (i, 0)
            w_map = lambda i, j: (0, j)
            b_map = lambda i, j: (0, j)
            o_map = lambda i, j: (i, j)
        else:
            grid = (nn, nm)
            x_map = lambda j, i: (i, 0)
            w_map = lambda j, i: (0, j)
            b_map = lambda j, i: (0, j)
            o_map = lambda j, i: (i, j)
        dim_sem = ("parallel", "parallel")
        scratch = []
        kernel = functools.partial(
            _linear_kernel_single_k, compute_dtype=compute_dtype, has_bias=has_bias
        )
        bytes_accessed = (
            (x_bytes + nm * w_bytes) if m_outer else (w_bytes + nn * x_bytes)
        )
    else:
        if m_outer:
            grid = (nm, nn, nk)
            x_map = lambda i, j, k: (i, k)
            w_map = lambda i, j, k: (k, j)
            b_map = lambda i, j, k: (0, j)
            o_map = lambda i, j, k: (i, j)
        else:
            grid = (nn, nm, nk)
            x_map = lambda j, i, k: (i, k)
            w_map = lambda j, i, k: (k, j)
            b_map = lambda j, i, k: (0, j)
            o_map = lambda j, i, k: (i, j)
        dim_sem = ("parallel", "parallel", "arbitrary")
        scratch = [pltpu.VMEM((tm, tn), jnp.float32)]
        kernel = functools.partial(
            _linear_kernel_multi_k, compute_dtype=compute_dtype, has_bias=has_bias
        )
        bytes_accessed = nn * x_bytes + nm * w_bytes

    bytes_accessed += Mp * Np * o_isz
    if has_bias:
        bytes_accessed += Np * b_isz

    in_specs = [
        pl.BlockSpec((tm, tk), x_map),
        pl.BlockSpec((tk, tn), w_map),
    ]
    args = [x2d, w_kn]
    if has_bias:
        in_specs.append(pl.BlockSpec((1, tn), b_map))
        args.append(b_row)

    out = pl.pallas_call(
        kernel,
        out_shape=jax.ShapeDtypeStruct((Mp, Np), x.dtype),
        grid_spec=pltpu.PrefetchScalarGridSpec(
            num_scalar_prefetch=0,
            grid=grid,
            in_specs=in_specs,
            out_specs=pl.BlockSpec((tm, tn), o_map),
            scratch_shapes=scratch,
        ),
        compiler_params=pltpu.CompilerParams(
            dimension_semantics=dim_sem,
            vmem_limit_bytes=int(budget),
        ),
        cost_estimate=pl.CostEstimate(
            flops=2 * Mp * Np * Kp,
            transcendentals=0,
            bytes_accessed=int(bytes_accessed),
        ),
    )(*args)

    return out[:M, :out_dim].reshape(*lead, out_dim)


# --------------------------------------------------------------------------- #
# Public API
# --------------------------------------------------------------------------- #
def make_linear_projection(weight, bias=None, *, use_bf16_mxu=False):
    """Build y = x @ weight.T + bias (torch.nn.Linear forward) for fixed params.

    weight: (output_dim, input_dim)  -- PyTorch layout.
    bias:   (output_dim,) or None.

    The weight is transposed to (K, N) and zero-padded to lane multiples ONCE
    here (outside the per-call hot path). Set use_bf16_mxu=True to run the MXU
    in bf16 with f32 accumulation (fast path on v6e/v7x; only if numerics allow).
    """
    N, K = weight.shape
    Kp = _round_up(K, 128)
    Np = _round_up(N, 128)

    w_kn = jnp.zeros((Kp, Np), dtype=weight.dtype).at[:K, :N].set(weight.T)
    compute_dtype = jnp.dtype(weight.dtype)
    if use_bf16_mxu and compute_dtype == jnp.dtype(jnp.float32):
        w_kn = w_kn.astype(jnp.bfloat16)
        compute_dtype = jnp.dtype(jnp.bfloat16)

    b_row = None
    if bias is not None:
        b_row = jnp.zeros((1, Np), dtype=bias.dtype).at[0, :N].set(bias)

    fwd = jax.jit(
        functools.partial(_linear_forward, out_dim=N, compute_dtype=compute_dtype)
    )

    def apply(x):
        return fwd(x, w_kn, b_row)

    return apply


def linear_projection(x, weight, bias=None, *, use_bf16_mxu=False):
    """One-shot convenience wrapper (re-prepares params each call).

    For repeated application with fixed parameters prefer make_linear_projection.
    """
    return make_linear_projection(weight, bias, use_bf16_mxu=use_bf16_mxu)(x)


if __name__ == "__main__":
    # Shapes consistent with the module: batch=2, seq=8, input_dim=32 -> output_dim=64
    input_dim, output_dim = 32, 64
    batch, seq = 2, 8

    key = jax.random.PRNGKey(0)
    kx, kw, kb = jax.random.split(key, 3)

    x = jax.random.normal(kx, (batch, seq, input_dim), dtype=jnp.float32)
    bound = 1.0 / (input_dim ** 0.5)
    weight = jax.random.uniform(kw, (output_dim, input_dim), jnp.float32, -bound, bound)
    bias = jax.random.uniform(kb, (output_dim,), jnp.float32, -bound, bound)

    # With-bias path (default nn.Linear configuration).
    proj = make_linear_projection(weight, bias)
    y = proj(x)
    jax.block_until_ready(y)
    y_ref = x @ weight.T + bias
    assert y.shape == (batch, seq, output_dim)
    assert jnp.allclose(y, y_ref, atol=1e-5, rtol=1e-5), "mismatch vs reference (bias)"

    # No-bias path (bias=False in the module).
    proj_nb = make_linear_projection(weight, None)
    y_nb = proj_nb(x)
    jax.block_until_ready(y_nb)
    y_nb_ref = x @ weight.T
    assert jnp.allclose(y_nb, y_nb_ref, atol=1e-5, rtol=1e-5), "mismatch vs reference (no bias)"

    print("KERNEL_OK")
</pallas_src>

<mosaic_0001>
module attributes {stable_mosaic.version = 11 : i64} {
  func.func @_linear_kernel_single_k(%arg0: i32, %arg1: i32, %arg2: memref<16x128xf32, #tpu.memory_space<vmem>>, %arg3: memref<128x128xf32, #tpu.memory_space<vmem>>, %arg4: memref<1x128xf32, #tpu.memory_space<vmem>>, %arg5: memref<16x128xf32, #tpu.memory_space<vmem>>) attributes {dimension_semantics = [#tpu.dimension_semantics<parallel>, #tpu.dimension_semantics<parallel>], iteration_bounds = array<i64: 1, 1>, scalar_prefetch = 0 : i64, scratch_operands = 0 : i64, tpu.core_type = #tpu.core_type<tc>, window_params = [{transform_indices = @transform_0, window_bounds = array<i64: 16, 128>}, {transform_indices = @transform_1, window_bounds = array<i64: 128, 128>}, {transform_indices = @transform_2, window_bounds = array<i64: 1, 128>}, {transform_indices = @transform_3, window_bounds = array<i64: 16, 128>}]} {
    %c0 = arith.constant 0 : index
    %c0_0 = arith.constant 0 : index
    %0 = vector.load %arg2[%c0, %c0_0] : memref<16x128xf32, #tpu.memory_space<vmem>>, vector<16x128xf32>
    %c0_1 = arith.constant 0 : index
    %c0_2 = arith.constant 0 : index
    %1 = vector.load %arg3[%c0_1, %c0_2] : memref<128x128xf32, #tpu.memory_space<vmem>>, vector<128x128xf32>
    %cst = arith.constant dense<0.000000e+00> : vector<16x128xf32>
    %2 = tpu.matmul %0, %1, %cst {dimension_numbers = #tpu.dot_dimension_numbers<[1], [0], [0], [1], [0, 0, 1, 1], [], []>} : vector<16x128xf32>, vector<128x128xf32>, vector<16x128xf32> -> vector<16x128xf32>
    %c0_3 = arith.constant 0 : index
    %c0_4 = arith.constant 0 : index
    %3 = vector.load %arg4[%c0_3, %c0_4] : memref<1x128xf32, #tpu.memory_space<vmem>>, vector<1x128xf32>
    %4 = vector.broadcast %3 : vector<1x128xf32> to vector<16x128xf32>
    %5 = arith.addf %2, %4 : vector<16x128xf32>
    %c0_5 = arith.constant 0 : index
    %c0_6 = arith.constant 0 : index
    %6 = vector.load %arg5[%c0_5, %c0_6] : memref<16x128xf32, #tpu.memory_space<vmem>>, vector<16x128xf32>
    tpu.vector_store %arg5[%c0_5, %c0_6], %5 {strides = array<i32>} : memref<16x128xf32, #tpu.memory_space<vmem>>, vector<16x128xf32>,
    return
  }
  func.func @transform_0(%arg0: i32, %arg1: i32) -> (i32, i32) {
    %c0_i32 = arith.constant 0 : i32
    %c0_i32_0 = arith.constant 0 : i32
    return %arg0, %c0_i32 : i32, i32
  }
  func.func @transform_1(%arg0: i32, %arg1: i32) -> (i32, i32) {
    %c0_i32 = arith.constant 0 : i32
    %c0_i32_0 = arith.constant 0 : i32
    return %c0_i32, %arg1 : i32, i32
  }
  func.func @transform_2(%arg0: i32, %arg1: i32) -> (i32, i32) {
    %c0_i32 = arith.constant 0 : i32
    %c0_i32_0 = arith.constant 0 : i32
    return %c0_i32, %arg1 : i32, i32
  }
  func.func @transform_3(%arg0: i32, %arg1: i32) -> (i32, i32) {
    %c0_i32 = arith.constant 0 : i32
    return %arg0, %arg1 : i32, i32
  }
}

</mosaic_0001>

<bundles_post_ra>
// kernel: _linear_forward.1
= control target key start
LH: loop header
LB: loop body
LE: loop exit
PB: predicated region body
PF: predicated region fallthrough
CT: control target
= control target key end

     0   :  { %8 = vsyncpa [#allocation3], 0  ;;  %s128_s15 = smov [#allocation2]   ;;  %s129_s17 = smov 128   ;;  %s169_s0 = inlined_call_operand.vmem [shape: f32[16,128], index: 0, kind: input, shape index: {}]   ;;  %s170_s1 = inlined_call_operand.hbm [shape: f32[128,128], index: 1, kind: input, shape index: {}]   ;;  %s171_s2 = inlined_call_operand.vmem [shape: f32[1,128], index: 2, kind: input, shape index: {}]   ;;  %s172_s3 = inlined_call_operand.vmem [shape: f32[16,128], index: 3, kind: output, shape index: {}]  }
   0x1   :  { %s15_s14 = sshll.u32 %s170_s1, 4  ;;  %s17_s16 = sshll.u32 %s128_s15, 4  ;;  %s16_s14 = int_to_ptr.hbm [resolvable:$true] %s15_s14  ;;  %s18_s16 = int_to_ptr.vmem [resolvable:$true] %s17_s16 }
   0x2   :  { %s130_s18 = smov 8  }
   0x3   :  { %23 = dma.hbm_to_vmem [thread:$0]  %s16_s14, 2048, %s18_s16, [#allocation3], %s129_s17, %s129_s17, %s130_s18  }
   0x4   :  { %126 = dma.done.wait [#allocation3], 2048  }
   0x5   :  { %127 = vsyncadd [#allocation3], 4294965248  ;;  %v47_v0 = vld [vmem:[#allocation2 + $0x78] sm:$0xff]  ;;  %v46_v1 = vld [vmem:[#allocation2 + $0x70] sm:$0xff] }
   0x6   :  { %52 = vmatpush.msra.mxu0 %v47_v0  ;;  %82 = vmatpush.msra.mxu1 %v47_v0  ;;  %v45_v2 = vld [vmem:[#allocation2 + $0x68] sm:$0xff]  ;;  %v44_v3 = vld [vmem:[#allocation2 + $0x60] sm:$0xff]  ;;  %v43_v4 = vld [vmem:[#allocation2 + $0x58] sm:$0xff] }
   0x7   :  { %v42_v5 = vld [vmem:[#allocation2 + $0x50] sm:$0xff]  ;;  %v41_v6 = vld [vmem:[#allocation2 + $0x48] sm:$0xff]  ;;  %v40_v7 = vld [vmem:[#allocation2 + $0x40] sm:$0xff] }
   0x8   :  { %53 = vmatpush.msra.mxu0 %v46_v1  ;;  %83 = vmatpush.msra.mxu1 %v46_v1  ;;  %v39_v8 = vld [vmem:[#allocation2 + $0x38] sm:$0xff]  ;;  %v38_v9 = vld [vmem:[#allocation2 + $0x30] sm:$0xff]  ;;  %v37_v10 = vld [vmem:[#allocation2 + $0x28] sm:$0xff] }
   0x9   :  { %v36_v11 = vld [vmem:[#allocation2 + $0x20] sm:$0xff]  ;;  %v35_v12 = vld [vmem:[#allocation2 + $0x18] sm:$0xff]  ;;  %v34_v13 = vld [vmem:[#allocation2 + $0x10] sm:$0xff] }
   0xa   :  { %54 = vmatpush.msra.mxu0 %v45_v2  ;;  %84 = vmatpush.msra.mxu1 %v45_v2  ;;  %v33_v14 = vld [vmem:[#allocation2 + $0x8] sm:$0xff]  ;;  %v32_v15 = vld [vmem:[#allocation2] sm:$0xff] }
   0xb   :  { %v30_v16 = vld [vmem:[%s169_s0] sm:$0xff]  ;;  %v31_v17 = vld [vmem:[%s169_s0 + $0x8] sm:$0xff] }
   0xc   :  { %55 = vmatpush.msra.mxu0 %v44_v3  ;;  %85 = vmatpush.msra.mxu1 %v44_v3  ;;  %v101_v18 = vld [vmem:[%s171_s2] ss:$0 sm:$0xff] }
   0xe   :  { %56 = vmatpush.msra.mxu0 %v43_v4  ;;  %86 = vmatpush.msra.mxu1 %v43_v4 }
  0x10   :  { %57 = vmatpush.msra.mxu0 %v42_v5  ;;  %87 = vmatpush.msra.mxu1 %v42_v5 }
  0x12   :  { %58 = vmatpush.msra.mxu0 %v41_v6  ;;  %88 = vmatpush.msra.mxu1 %v41_v6 }
  0x14   :  { %59 = vmatpush.msra.mxu0 %v40_v7  ;;  %89 = vmatpush.msra.mxu1 %v40_v7 }
  0x16   :  { %60 = vmatpush.msra.mxu0 %v39_v8  ;;  %90 = vmatpush.msra.mxu1 %v39_v8 }
  0x18   :  { %61 = vmatpush.msra.mxu0 %v38_v9  ;;  %91 = vmatpush.msra.mxu1 %v38_v9 }
  0x1a   :  { %62 = vmatpush.msra.mxu0 %v37_v10  ;;  %92 = vmatpush.msra.mxu1 %v37_v10 }
  0x1c   :  { %63 = vmatpush.msra.mxu0 %v36_v11  ;;  %93 = vmatpush.msra.mxu1 %v36_v11 }
  0x1e   :  { %64 = vmatpush.msra.mxu0 %v35_v12  ;;  %94 = vmatpush.msra.mxu1 %v35_v12 }
  0x20   :  { %65 = vmatpush.msra.mxu0 %v34_v13  ;;  %95 = vmatpush.msra.mxu1 %v34_v13 }
  0x22   :  { %66 = vmatpush.msra.mxu0 %v33_v14  ;;  %96 = vmatpush.msra.mxu1 %v33_v14 }
  0x24   :  { %67 = vmatpush.msra.mxu0 %v32_v15  ;;  %97 = vmatpush.msra.mxu1 %v32_v15 }
  0x25   :  { %68 = vmatmul.f32.vlgmr.msra.gmra.mxu0 %v30_v16  ;;  %71 = vmatmul.f32.vlgmr.msra.gmra.mxu1 %v31_v17 }
  0xa2   :  { %v69_v19 = vpop.f32.mrf.mxu0  ;;  %v72_v20 = vpop.f32.mrf.mxu1 }
  0xa3   :  { %v70_v21 = vadd.f32 %v101_v18, %v69_v19  ;;  %v73_v22 = vadd.f32 %v101_v18, %v72_v20 }
  0xa5   :  { %75 = vst [vmem:[%s172_s3] sm:$0xff] %v70_v21 }
  0xa6   :  { %76 = vst [vmem:[%s172_s3 + $0x8] sm:$0xff] %v73_v22 }
  0xa7   :  { %81 = vsyncpa [#allocation3], 1 }

</bundles_post_ra>
